<compile_context>
chip_gen: v7x
topology: tpu7x:2x2x1
jax: 0.10.0
libtpu: 0.0.40
codegen_flags: <defaults>
</compile_context>

<pallas_src>
import warnings

import numpy as np
import jax
import jax.numpy as jnp
from jax import lax
from jax.experimental import pallas as pl
from jax.experimental.pallas import tpu as pltpu


# ---------------------------------------------------------------------------
# Host-side (numpy) constant construction
# ---------------------------------------------------------------------------
def _interp_matrix_np(l_out: int, l_in: int, scale: float) -> np.ndarray:
    """1-D bilinear interpolation matrix (l_out, l_in), PyTorch align_corners=False.

    Uses the user-supplied scale directly in the source-coordinate formula, matching
    PyTorch's default (recompute_scale_factor=None) behaviour when scale_factor is given.
    """
    i = np.arange(l_out, dtype=np.float64)
    src = (i + 0.5) / scale - 0.5
    src = np.maximum(src, 0.0)                 # PyTorch clamps negative src to 0
    i0f = np.floor(src)
    frac = (src - i0f).astype(np.float32)
    i0 = np.minimum(i0f.astype(np.int64), l_in - 1)
    i1 = np.minimum(i0 + 1, l_in - 1)
    w = np.zeros((l_out, l_in), dtype=np.float32)
    rows = np.arange(l_out)
    w[rows, i0] += (1.0 - frac)
    w[rows, i1] += frac
    return w


def _pick_row_fold(h_out: int, w_out: int) -> int:
    """Divisor RK of h_out (<=8) folding rows into lanes for dense output stores.

    Prefers RK*w_out that is an exact multiple of 128 (unmasked full-width stores),
    then the smallest RK with RK*w_out >= 128, then the largest divisor <= 8.
    """
    best_min = None
    for d in range(1, min(h_out, 8) + 1):
        if h_out % d:
            continue
        if (d * w_out) % 128 == 0:
            return d
        if best_min is None and d * w_out >= 128:
            best_min = d
    if best_min is not None:
        return best_min
    best = 1
    for d in range(1, min(h_out, 8) + 1):
        if h_out % d == 0:
            best = d
    return best


def _round_up(n: int, m: int) -> int:
    return ((n + m - 1) // m) * m


def _sublane_mult(dtype) -> int:
    return 8 * max(1, 4 // jnp.dtype(dtype).itemsize)


def _padded_tile_bytes(rows: int, cols: int, dtype) -> int:
    """Bytes of a 2-D VMEM tile after (sublane, lane) padding."""
    isz = jnp.dtype(dtype).itemsize
    return _round_up(max(1, rows), _sublane_mult(dtype)) * _round_up(max(1, cols), 128) * isz


def _pick_batch_tile(batch: int, per_image_bytes: int, budget_bytes: int) -> int:
    """Batch tile: fits the VMEM block budget and keeps >=4 grid steps (>=2 per v7x core)."""
    cap = max(1, budget_bytes // max(1, per_image_bytes))
    tb = max(1, min(cap, 64, batch))
    steps_target = min(batch, 4)
    tb = min(tb, -(-batch // steps_target))          # ceil(batch / steps_target)
    # Prefer an exact divisor close to tb to avoid a ragged (masked) edge block.
    for d in range(tb, 0, -1):
        if batch % d == 0:
            if 3 * d >= 2 * tb:
                return d
            break
    return tb


# ---------------------------------------------------------------------------
# Pallas kernel
# ---------------------------------------------------------------------------
def _make_kernel(rk: int, hor: int, cdtype):
    def kernel(x_ref, whs_ref, wcol_ref, o_ref):
        # x_ref   : (TB, H, Win)            columns (possibly W*C) in lanes
        # whs_ref : (RK*Hor, H)             row-interp matrix, scale folded in,
        #                                   RK interleaved row groups stacked along sublanes
        # wcol_ref: (Win, Wout)             column-interp matrix (kron with I_C for NHWC)
        # o_ref   : (TB, Hor, RK*Wout)      lane-dense free view of (TB, Ho, Wout)
        x = x_ref[...].astype(cdtype)

        # 1) Column interpolation (lane axis): (TB, H, Win) @ (Win, Wout) -> (TB, H, Wout).
        t = lax.dot_general(x, wcol_ref[...], (((2,), (0,)), ((), ())),
                            preferred_element_type=jnp.float32).astype(cdtype)

        tb = x.shape[0]

        # 2) Row interpolation (sublane axis): one broadcast + one batched MXU contraction
        #    producing all RK row groups at once: (TB, RK*Hor, Wout), f32 accumulation.
        wh = jnp.broadcast_to(whs_ref[...][None], (tb,) + whs_ref.shape)
        full = lax.dot_general(wh, t, (((2,), (1,)), ((0,), (0,))),
                               preferred_element_type=jnp.float32)

        # 3) Lane-concatenate the RK interleaved row groups so the store is one
        #    >=128-lane-wide (multiple-of-128 when possible) slab.
        if rk == 1:
            out = full
        else:
            out = jnp.concatenate(
                [full[:, j * hor:(j + 1) * hor, :] for j in range(rk)], axis=-1)

        o_ref[...] = out.astype(o_ref.dtype)

    return kernel


# ---------------------------------------------------------------------------
# Wrapper (forward-pass semantics of UpsampleResiduals)
# ---------------------------------------------------------------------------
def upsample_residuals(res: jnp.ndarray, scale: int = 2) -> jnp.ndarray:
    if res.shape[3] == 2 and res.shape[1] == 2:
        warnings.warn('Ambiguous Residual: both 2nd and 4th dimensions of residual are 2.')
    if res.shape[3] != 2 and res.shape[1] == 2:
        channel_permute = False
    else:
        channel_permute = True

    scale_f = float(scale)
    # bf16 residuals keep bf16 MXU operands (scale=2 interp weights exact in bf16);
    # everything else computes in f32.  Accumulation is always f32.
    cdtype = jnp.bfloat16 if res.dtype == jnp.bfloat16 else jnp.float32

    if channel_permute:
        # NHWC input: fold C into the lane axis (free reshape, no transpose).
        n, h, w, c = res.shape
        ho, wo = int(np.floor(h * scale_f)), int(np.floor(w * scale_f))
        xf = res.reshape(n, h, w * c)
        win, wout = w * c, wo * c
        wcol_np = np.kron(_interp_matrix_np(wo, w, scale_f).T,
                          np.eye(c, dtype=np.float32))           # (W*C, Wo*C)
    else:
        # NCHW input: fold (N, C) into one batch axis (free reshape).
        n, c, h, w = res.shape
        ho, wo = int(np.floor(h * scale_f)), int(np.floor(w * scale_f))
        xf = res.reshape(n * c, h, w)
        win, wout = w, wo
        wcol_np = _interp_matrix_np(wo, w, scale_f).T            # (W, Wo)

    batch = xf.shape[0]

    # Row-interp matrix with the module's `result *= scale` folded in.
    wh_np = _interp_matrix_np(ho, h, scale_f) * scale_f          # (Ho, H)

    # Lane-dense output: fold RK consecutive output rows into the lane axis.
    rk = _pick_row_fold(ho, wout)
    hor = ho // rk
    whs_np = np.ascontiguousarray(
        wh_np.reshape(hor, rk, h).transpose(1, 0, 2)).reshape(rk * hor, h)

    whs = jnp.asarray(whs_np, dtype=cdtype)
    wcol = jnp.asarray(wcol_np, dtype=cdtype)

    # ---------------- VMEM budgeting (padding-aware, generation-aware) ----------------
    vmem_cap = 64 * 1024 * 1024                      # conservative fallback (v7x-sized)
    try:
        info = pltpu.get_tpu_info()
        cap = getattr(info, "vmem_capacity_bytes", None)
        if cap:
            vmem_cap = int(cap)
    except Exception:
        pass
    # ~48 MiB on v7x (64 MiB physical/core), up to 96 MiB on v5e/v6e (128 MiB physical).
    vmem_limit = min(int(0.75 * vmem_cap), 96 * 1024 * 1024)

    per_image = (
        2 * _padded_tile_bytes(h, win, res.dtype)            # x block (double-buffered)
        + 2 * _padded_tile_bytes(hor, rk * wout, res.dtype)  # out block (double-buffered)
        + _padded_tile_bytes(h, wout, cdtype)                # t intermediate
        + _padded_tile_bytes(rk * hor, h, cdtype)            # broadcast row matrix
        + _padded_tile_bytes(rk * hor, wout, jnp.float32)    # f32 accumulation result
        + _padded_tile_bytes(hor, rk * wout, jnp.float32)    # lane-concat temporary
    )
    const_bytes = (2 * _padded_tile_bytes(rk * hor, h, cdtype)
                   + 2 * _padded_tile_bytes(win, wout, cdtype))

    block_budget = int(0.8 * vmem_limit) - const_bytes
    tb = _pick_batch_tile(batch, per_image, block_budget)
    needed = const_bytes + per_image * tb + (2 << 20)
    vmem_limit = int(max(vmem_limit, min(vmem_cap, needed)))
    # TODO(synk): for single images too large to fit at tb=1 (very large H*W on v7x),
    # add a second grid axis tiling Hor with matching whs row-group slices.

    grid = (pl.cdiv(batch, tb),)                     # ragged last block OK (masked)

    kernel = _make_kernel(rk, hor, cdtype)
    out = pl.pallas_call(
        kernel,
        out_shape=jax.ShapeDtypeStruct((batch, hor, rk * wout), res.dtype),
        grid=grid,
        in_specs=[
            pl.BlockSpec((tb, h, win), lambda b: (b, 0, 0)),
            pl.BlockSpec((rk * hor, h), lambda b: (0, 0)),
            pl.BlockSpec((win, wout), lambda b: (0, 0)),
        ],
        out_specs=pl.BlockSpec((tb, hor, rk * wout), lambda b: (b, 0, 0)),
        compiler_params=pltpu.CompilerParams(
            dimension_semantics=("parallel",),
            vmem_limit_bytes=vmem_limit,
        ),
    )(xf, whs, wcol)

    # All reshapes below are row-major compatible -> free views, no HBM transpose.
    if channel_permute:
        return out.reshape(n, ho, wo, c)
    return out.reshape(n, c, ho, wo)


# ---------------------------------------------------------------------------
# Pure-numpy reference (replicates torch.nn.functional.interpolate(bilinear)*scale)
# ---------------------------------------------------------------------------
def _reference_numpy(res: np.ndarray, scale: int = 2) -> np.ndarray:
    channel_permute = not (res.shape[3] != 2 and res.shape[1] == 2)
    x = np.transpose(res, (0, 3, 1, 2)) if channel_permute else res
    n, c, h, w = x.shape
    ho, wo = h * scale, w * scale

    def coords(l_out, l_in):
        src = np.maximum((np.arange(l_out) + 0.5) / scale - 0.5, 0.0)
        i0 = np.minimum(np.floor(src).astype(np.int64), l_in - 1)
        i1 = np.minimum(i0 + 1, l_in - 1)
        frac = src - np.floor(src)
        return i0, i1, frac

    h0, h1, hf = coords(ho, h)
    w0, w1, wf = coords(wo, w)
    hf = hf[:, None]
    wf = wf[None, :]
    top = x[:, :, h0][:, :, :, w0] * (1 - wf) + x[:, :, h0][:, :, :, w1] * wf
    bot = x[:, :, h1][:, :, :, w0] * (1 - wf) + x[:, :, h1][:, :, :, w1] * wf
    out = (top * (1 - hf) + bot * hf) * scale
    if channel_permute:
        out = np.transpose(out, (0, 2, 3, 1))
    return out.astype(res.dtype)


if __name__ == "__main__":
    key = jax.random.PRNGKey(0)
    k1, k2, k3 = jax.random.split(key, 3)

    # NHWC residual: shape[3] == 2 (flow-like 2-channel residual) -> channel_permute=True
    res_nhwc = jax.random.normal(k1, (2, 16, 16, 2), dtype=jnp.float32)
    out = jax.block_until_ready(upsample_residuals(res_nhwc, scale=2))
    assert out.shape == (2, 32, 32, 2), out.shape
    ref = _reference_numpy(np.asarray(res_nhwc), scale=2)
    np.testing.assert_allclose(np.asarray(out), ref, rtol=1e-5, atol=1e-5)

    # NCHW residual: shape[1] == 2 and shape[3] != 2 -> channel_permute=False
    res_nchw = jax.random.normal(k2, (2, 2, 16, 16), dtype=jnp.float32)
    out2 = jax.block_until_ready(upsample_residuals(res_nchw, scale=2))
    assert out2.shape == (2, 2, 32, 32), out2.shape
    ref2 = _reference_numpy(np.asarray(res_nchw), scale=2)
    np.testing.assert_allclose(np.asarray(out2), ref2, rtol=1e-5, atol=1e-5)

    # bf16 residual: bf16 MXU operands with f32 accumulation (looser tolerance)
    res_bf16 = jax.random.normal(k3, (2, 16, 16, 2), dtype=jnp.bfloat16)
    out3 = jax.block_until_ready(upsample_residuals(res_bf16, scale=2))
    assert out3.shape == (2, 32, 32, 2), out3.shape
    ref3 = _reference_numpy(np.asarray(res_bf16, dtype=np.float32), scale=2)
    np.testing.assert_allclose(np.asarray(out3, dtype=np.float32), ref3, rtol=5e-2, atol=5e-2)

    print("KERNEL_OK")
</pallas_src>

<mosaic_0001>
module attributes {stable_mosaic.version = 11 : i64} {
  func.func @kernel(%arg0: i32, %arg1: memref<1x16x32xf32, #tpu.memory_space<vmem>>, %arg2: memref<32x16xf32, #tpu.memory_space<vmem>>, %arg3: memref<32x64xf32, #tpu.memory_space<vmem>>, %arg4: memref<1x16x128xf32, #tpu.memory_space<vmem>>) attributes {dimension_semantics = [#tpu.dimension_semantics<parallel>], iteration_bounds = array<i64: 2>, scalar_prefetch = 0 : i64, scratch_operands = 0 : i64, tpu.core_type = #tpu.core_type<tc>, window_params = [{transform_indices = @transform_0, window_bounds = array<i64: 1, 16, 32>}, {pipeline_mode = #tpu.pipeline_mode<synchronous>, transform_indices = @transform_1, window_bounds = array<i64: 32, 16>}, {pipeline_mode = #tpu.pipeline_mode<synchronous>, transform_indices = @transform_2, window_bounds = array<i64: 32, 64>}, {transform_indices = @transform_3, window_bounds = array<i64: 1, 16, 128>}]} {
    %c0 = arith.constant 0 : index
    %c0_0 = arith.constant 0 : index
    %c0_1 = arith.constant 0 : index
    %0 = vector.load %arg1[%c0, %c0_0, %c0_1] : memref<1x16x32xf32, #tpu.memory_space<vmem>>, vector<1x16x32xf32>
    %c0_2 = arith.constant 0 : index
    %c0_3 = arith.constant 0 : index
    %1 = vector.load %arg3[%c0_2, %c0_3] : memref<32x64xf32, #tpu.memory_space<vmem>>, vector<32x64xf32>
    %cst = arith.constant dense<0.000000e+00> : vector<1x16x64xf32>
    %2 = tpu.matmul %0, %1, %cst {dimension_numbers = #tpu.dot_dimension_numbers<[2], [0], [0, 1], [1], [0, 0, 0, 1, 1, 1], [], []>} : vector<1x16x32xf32>, vector<32x64xf32>, vector<1x16x64xf32> -> vector<1x16x64xf32>
    %c0_4 = arith.constant 0 : index
    %c0_5 = arith.constant 0 : index
    %3 = vector.load %arg2[%c0_4, %c0_5] : memref<32x16xf32, #tpu.memory_space<vmem>>, vector<32x16xf32>
    %4 = vector.shape_cast %3 : vector<32x16xf32> to vector<1x32x16xf32>
    %cst_6 = arith.constant dense<0.000000e+00> : vector<1x32x64xf32>
    %5 = tpu.matmul %4, %2, %cst_6 {dimension_numbers = #tpu.dot_dimension_numbers<[2], [1], [1], [2], [0, 0, 0, 1, 1, 2], [0], [0]>} : vector<1x32x16xf32>, vector<1x16x64xf32>, vector<1x32x64xf32> -> vector<1x32x64xf32>
    %6 = vector.extract_strided_slice %5 {offsets = [0, 0, 0], sizes = [1, 16, 64], strides = [1, 1, 1]} : vector<1x32x64xf32> to vector<1x16x64xf32>
    %7 = vector.extract_strided_slice %5 {offsets = [0, 16, 0], sizes = [1, 16, 64], strides = [1, 1, 1]} : vector<1x32x64xf32> to vector<1x16x64xf32>
    %8 = tpu.concatenate %6, %7 in 2 : vector<1x16x64xf32>, vector<1x16x64xf32> -> vector<1x16x128xf32>
    %c0_7 = arith.constant 0 : index
    %c0_8 = arith.constant 0 : index
    %c0_9 = arith.constant 0 : index
    %9 = vector.load %arg4[%c0_7, %c0_8, %c0_9] : memref<1x16x128xf32, #tpu.memory_space<vmem>>, vector<1x16x128xf32>
    tpu.vector_store %arg4[%c0_7, %c0_8, %c0_9], %8 {strides = array<i32>} : memref<1x16x128xf32, #tpu.memory_space<vmem>>, vector<1x16x128xf32>,
    return
  }
  func.func @transform_0(%arg0: i32) -> (i32, i32, i32) {
    %c0_i32 = arith.constant 0 : i32
    %c0_i32_0 = arith.constant 0 : i32
    %c0_i32_1 = arith.constant 0 : i32
    return %arg0, %c0_i32, %c0_i32_0 : i32, i32, i32
  }
  func.func @transform_1(%arg0: i32) -> (i32, i32) {
    %c0_i32 = arith.constant 0 : i32
    %c0_i32_0 = arith.constant 0 : i32
    %c0_i32_1 = arith.constant 0 : i32
    return %c0_i32, %c0_i32_0 : i32, i32
  }
  func.func @transform_2(%arg0: i32) -> (i32, i32) {
    %c0_i32 = arith.constant 0 : i32
    %c0_i32_0 = arith.constant 0 : i32
    %c0_i32_1 = arith.constant 0 : i32
    return %c0_i32, %c0_i32_0 : i32, i32
  }
  func.func @transform_3(%arg0: i32) -> (i32, i32, i32) {
    %c0_i32 = arith.constant 0 : i32
    %c0_i32_0 = arith.constant 0 : i32
    %c0_i32_1 = arith.constant 0 : i32
    return %arg0, %c0_i32, %c0_i32_0 : i32, i32, i32
  }
}

</mosaic_0001>

<bundles_post_ra>
// kernel: tpu_custom_call.1
= control target key start
LH: loop header
LB: loop body
LE: loop exit
PB: predicated region body
PF: predicated region fallthrough
CT: control target
= control target key end

     0   :  { %8 = vsyncpa [#allocation3], 0  ;;  %s870_s0 = inlined_call_operand.vmem [shape: f32[2,16,32], index: 0, kind: input, shape index: {}]   ;;  %s871_s1 = inlined_call_operand.vmem [shape: f32[32,16], index: 1, kind: input, shape index: {}]   ;;  %s872_s2 = inlined_call_operand.hbm [shape: f32[32,64], index: 2, kind: input, shape index: {}]   ;;  %s873_s3 = inlined_call_operand.hbm [shape: f32[2,16,128], index: 3, kind: output, shape index: {}]  }
   0x1   :  { %9 = vsyncpa [#allocation4], 0 }
   0x2   :  { %11 = vsyncpa [#allocation4 + $0x1], 0  ;;  %s720_s12 = smov 0   ;;  %s722_s13 = smov 0  }
   0x3   :  { %s724_s14 = smov 0   ;;  %s726_s15 = smov 0  }
   0x4 LB: > { %s741_s16 = sadd.s32 4294967295, %s691_s15   ;;  %s475_s17 = sadd.s32 4294967294, %s691_s15   ;;  %s691_s15 = sphi %s726_s15, %s889_s15   ;;  %s687_s14 = sphi %s724_s14, %s888_s14   ;;  %s683_s13 = sphi %s722_s13, %s887_s13   ;;  %s679_s12 = sphi %s720_s12, %s886_s12  }
   0x5   : > { %s745_s18 = sadd.s32 1, %s691_s15   ;;  %s92_s19 = sadd.s32 1, %s687_s14 }
   0x6   : > { %s89_s20 = ssub.s32 %s691_s15, %s745_s18  ;;  %p102_p0 = scmp.ne.s32.totalorder %s687_s14, %s683_s13 }
   0x7   : > { %p90_p1 = scmp.eq.s32.totalorder %s89_s20, 0  ;;  %p103_p2 = scmp.eq.s32.totalorder %s741_s16, 1 }
   0x8   : > { %p108_p3 = scmp.ne.s32.totalorder %s683_s13, %s679_s12  ;;  %p109_p4 = scmp.eq.s32.totalorder %s475_s17, 1 }
   0x9   : > { %s756_s21 = scalar_select %p90_p1, %s687_s14, %s92_s19  }
   0xa   : > { %p758_p5 = por %p103_p2, %p102_p0  ;;  %p762_p6 = por %p109_p4, %p108_p3 }
   0xb   : > { %p476_p7 = scmp.ge.s32.totalorder %s691_s15, 1  ;;  %p116_p8 = scmp.lt.s32.totalorder %s691_s15, 3 }
   0xc   : > { %s877_s22 = scalar_select %p758_p5, 1, 0 }
   0xd   : > { %s878_s23 = scalar_select %p762_p6, 1, 0 }
   0xe   : > { %p874_p9 = scmp.eq.s32.totalorder %s741_s16, 0  ;;  %p769_p10 = pnand %p476_p7, %p116_p8 }
   0xf   : > { %s693_s25 = smov [#allocation2]   ;;  %s597_s30 = scalar_lea.hbm %s872_s2, 512 }
  0x10   : > { %s879_s24 = scalar_select %p769_p10, 1, 0 }
  0x11   : > { %s131_s26 = sshll.u32 %s693_s25, 4  ;;  %p548_p11 = pneg %p769_p10  ;;  %s132_s26 = int_to_ptr.vmem [resolvable:$true] %s131_s26 }
  0x12   : > { %p598_p13 = scmp.ne.s32.totalorder %s872_s2, %s597_s30  ;;  %p604_p3 = scmp.lt.u32.totalorder %s597_s30, %s872_s2 }
  0x13   : > { %p777_p12 = pnand %p874_p9, %p548_p11 }
  0x15   : > { %p599_p0 = pneg %p777_p12 }
  0x17   : > { %p600_p1 = pnand %p599_p0, %p598_p13 }
  0x19   : > { %p601_p2 = pneg %p600_p1 }
  0x1b   : > { %p606_p4 = pnand %p604_p3, %p601_p2 }
  0x1d   : > { %609 = shalt.err (!%p606_p4)
}
  0x1e   : > { %s610_s8 = scalar_lea.vmem %s132_s26, 512  ;;  %p618_p9 = scmp.lt.s32.totalorder %s132_s26, %s132_s26 }
  0x1f   : > { %p611_p7 = scmp.ne.s32.totalorder %s132_s26, %s610_s8  ;;  %p619_p6 = scmp.lt.s32.totalorder %s610_s8, %s610_s8 }
  0x21   : > { %p613_p8 = pnand %p611_p7, %p599_p0  ;;  %p620_p5 = por %p619_p6, %p618_p9 }
  0x23   : > { %p614_p11 = pneg %p613_p8 }
  0x25   : > { %p621_p10 = pnand %p620_p5, %p614_p11 }
  0x27   : > { %624 = shalt.err (!%p621_p10)
}
  0x28   : > { %s694_s9 = smov 128   ;;  %s695_s10 = smov 8  }
  0x29   : > { %551 = dma.hbm_to_vmem [thread:$0]  (!%p777_p12), %s872_s2, 512, %s132_s26, [#allocation3], %s694_s9, %s694_s9, %s695_s10  }
  0x2a   : > { %p881_p13 = scmp.ne.s32.totalorder %s879_s24, 0 }
  0x2b   : > { %p882_p1 = scmp.eq.s32.totalorder (!%p881_p13), %s741_s16, 0 }
  0x2c   : > { %155 = sbr.rel (%p881_p13) target bundleno = 634 (0x27a), region = 32 }
  0x33   : > { %670 = dma.done.wait (%p882_p1), [#allocation3], 512   ;;  %p883_p0 = pmov %p882_p1 }
  0x34   : > { %p179_p5 = scmp.lt.s32.totalorder %s741_s16, 1  ;;  %vm190_vm0 = vcmask 261120   ;;  %v186_v0 = vld [vmem:[#allocation2] sm:$0xff]  ;;  %v187_v1 = vld [vmem:[#allocation2 + $0x8] sm:$0xff]  ;;  %v188_v2 = vld [vmem:[#allocation2 + $0x10] sm:$0xff]  ;;  %vm276_vm1 = vcmask 130048  }
  0x35   : > { %672 = vsyncadd (%p883_p0), [#allocation3], 4294966784  ;;  %v530_v3 = vpack.c.bf16 %v187_v1, %v186_v0  ;;  %v189_v4 = vld [vmem:[#allocation2 + $0x18] sm:$0xff]  ;;  %v272_v8 = vld [vmem:[%s871_s1] sm:$0xff]  ;;  %s696_s8 = smov 64   ;;  %s176_s9 = sand.u32 1, %s683_s13  }
  0x36   : > { %s180_s19 = scalar_select %p179_p5, %s741_s16, 1  ;;  %v534_v6 = vpack.c.bf16 %v189_v4, %v188_v2  ;;  %524 = vmatprep.mubr.msk.f32.mxu1 %vm276_vm1, %v272_v8  ;;  %v273_v12 = vld [vmem:[%s871_s1 + $0x8] sm:$0xff]  ;;  %v274_v13 = vld [vmem:[%s871_s1 + $0x10] sm:$0xff]  ;;  %v275_v14 = vld [vmem:[%s871_s1 + $0x18] sm:$0xff]  ;;  %vm382_vm2 = vcmask 523264  }
  0x37   : > { %531 = vmatprep.subr.bf16.mxu0 %v530_v3  ;;  %s481_s10 = sshll.u32 %s176_s9, 4  ;;  %p884_p9 = scmp.ne.s32.totalorder %s877_s22, 0 }
  0x38   : > { %s495_s20 = sshll.u32 %s180_s19, 4  ;;  %533 = vmatpush3.bf16.msra.mxu0 %v530_v3  ;;  %s178_s11 = scalar_lea.vmem [#allocation5], %s481_s10 }
  0x39   : > { %s183_s28 = scalar_lea.vmem %s870_s0, %s495_s20  ;;  %535 = vmatprep.subr.bf16.mxu0 %v534_v6  ;;  %s401_s17 = sshll.u32 %s178_s11, 4  ;;  %s822_s17 = int_to_ptr.vmem [resolvable:$true] %s401_s17 }
  0x3a   : > { %v184_v5 = vld [vmem:[%s183_s28] sm:$0xff]  ;;  %v185_v7 = vld [vmem:[%s183_s28 + $0x8] sm:$0xff]  ;;  %s496_s19 = sshll.u32 %s741_s16, 8  ;;  %s829_s28 = scalar_lea.sflag [#allocation4], %s176_s9 }
  0x3b   : > { %517 = vmatprep.mubr.msk.f32.mxu0 %vm190_vm0, %v184_v5  ;;  %s827_s27 = scalar_lea.hbm %s873_s3, %s496_s19  ;;  %s625_s24 = scalar_lea.vmem %s822_s17, 256 }
  0x3c   : > { %537 = vmatpush3.bf16.msra.mxu0 %v534_v6  ;;  %p626_p6 = scmp.ne.s32.totalorder %s822_s17, %s625_s24  ;;  %s697_s16 = smov [#allocation5]  }
  0x3d   : > { %s629_s26 = sshll.u32 %s697_s16, 4  ;;  %s630_s26 = int_to_ptr.vmem [resolvable:$false] %s629_s26 }
  0x3e   : > { %p627_p10 = pnand %p626_p6, %p884_p9  ;;  %s631_s29 = scalar_lea.vmem %s630_s26, 512 }
  0x3f   : > { %518 = vmatmul.mubr.msk.f32.vlgmr.msra.gmra.mrb[0].mxu0 %vm190_vm0, %v185_v7  ;;  %p632_p2 = scmp.lt.s32.totalorder %s822_s17, %s630_s26  ;;  %p633_p3 = scmp.lt.s32.totalorder %s631_s29, %s625_s24 }
  0x40   : > { %p628_p12 = pneg %p627_p10 }
  0x41   : > { %p634_p4 = por %p633_p3, %p632_p2 }
  0x43   : > { %p635_p7 = pnand %p634_p4, %p628_p12 }
 0x112   : > { %v519_v9 = vpop.f32.mrb[0].mxu0 }
 0x113   : > { %v263_v10 = vpop.f32.mrb[1].mxu0 }
 0x114   : > { %v538_v11 = vpack.c.bf16 %v519_v9, %v263_v10 }
 0x116   : > { %539 = vmatprep.subr.bf16.mxu1 %v538_v11 }
 0x117   : > { %541 = vmatpush3.bf16.msra.mxu1 %v538_v11 }
 0x11a   : > { %525 = vmatmul.mubr.msk.f32.vlgmr.msra.gmra.mrb[0].mxu1 %vm276_vm1, %v273_v12 }
 0x11b   : > { %527 = vmatprep.mubr.msk.f32.mxu1 %vm276_vm1, %v274_v13 }
 0x11e   : > { %528 = vmatmul.mubr.msk.f32.gmra.mrb[2].mxu1 %vm276_vm1, %v275_v14 }
 0x1ed   : > { %v526_v15 = vpop.f32.mrb[0].mxu1 }
 0x1ee   : > { %v355_v16 = vpop.f32.mrb[1].mxu1 }
 0x1f1   : > { %v529_v17 = vpop.f32.mrb[2].mxu1 }
 0x1f2   : > { %v365_v18 = vpop.f32.mrb[3].mxu1 }
 0x1f3   : > { %376 = vrot.lane.b32.xlu0 %v365_v18, %s696_s8 }
 0x1f7   : > { %378 = vrot.lane.b32.xlu0 %v529_v17, %s696_s8 }
 0x265   : > { %v377_v19 = vpop.permute.xlu0 %376 }
 0x266   : > { %v383_v20 = vsel %vm382_vm2, %v355_v16, %v377_v19 }
 0x267   : > { %385 = vst [vmem:[%s178_s11] sm:$0xff] %v383_v20 }
 0x269   : > { %v379_v21 = vpop.permute.xlu0 %378 }
 0x26a   : > { %v384_v22 = vsel %vm382_vm2, %v526_v15, %v379_v21 }
 0x26b   : > { %386 = vst [vmem:[%s178_s11 + $0x8] sm:$0xff] %v384_v22 }
 0x26c   : > { %638 = shalt.err (!%p635_p7)
}
 0x26d   : > { %s639_s30 = scalar_lea.hbm %s827_s27, 256  ;;  %s643_s6 = scalar_lea.hbm %s873_s3, 512 }
 0x26e   : > { %p640_p8 = scmp.ne.s32.totalorder %s827_s27, %s639_s30  ;;  %p644_p1 = scmp.lt.u32.totalorder %s827_s27, %s873_s3 }
 0x26f   : > { %p645_p0 = scmp.lt.u32.totalorder %s643_s6, %s639_s30  ;;  %p647_p6 = scmp.lt.u32.totalorder %s639_s30, %s827_s27 }
 0x270   : > { %p641_p11 = pnand %p640_p8, %p884_p9 }
 0x271   : > { %p646_p5 = por %p645_p0, %p644_p1 }
 0x272   : > { %p642_p13 = pneg %p641_p11 }
 0x273   : > { %p648_p10 = por %p647_p6, %p646_p5 }
 0x275   : > { %p649_p12 = pnand %p648_p10, %p642_p13 }
 0x277   : > { %652 = shalt.err (!%p649_p12)
}
 0x278   : > { %s698_s9 = smov 128   ;;  %s699_s10 = smov 8  }
 0x279   : > { %546 = dma.vmem_to_hbm [thread:$0]  (%p884_p9), %s822_s17, 256, %s827_s27, %s829_s28, %s698_s9, %s698_s9, %s699_s10  }
 0x27a PF: > { %p558_p2 = scmp.ge.s32.totalorder %s691_s15, 2  ;;  %s416_s11 = sand.u32 1, %s679_s12  }
 0x27b   : > { %p885_p3 = scmp.ne.s32.totalorder %s878_s23, 0  ;;  %s417_s19 = scalar_lea.sflag [#allocation4], %s416_s11 }
 0x27d   : > { %p553_p4 = pnand %p558_p2, %p885_p3 }
 0x27f   : > { %674 = dma.done.wait (!%p553_p4), %s417_s19, 256  }
 0x280   : > { %676 = vsyncadd (!%p553_p4), %s417_s19, 4294967040  ;;  %p14_p7 = scmp.ge.s32.totalorder %s745_s18, 4   ;;  %s886_s12 = smov %s683_s13 }
 0x281   : > { %s887_s13 = smov %s687_s14  ;;  %s888_s14 = smov %s756_s21 }
 0x282   : > { %s889_s15 = smov %s745_s18  ;;  %16 = sbr.rel (!%p14_p7) target bundleno = 4 (0x4), region = 72 }
 0x289   :  { %422 = vsyncpa [#allocation3], 1 }
 0x28a   :  { %424 = vsyncpa [#allocation3 + $0x1], 1 }
 0x28b   :  { %425 = vsyncpa [#allocation4], 1 }
 0x28c   :  { %427 = vsyncpa [#allocation4 + $0x1], 1 }

</bundles_post_ra>
